<compile_context>
chip_gen: v7x
topology: tpu7x:2x2x1
jax: 0.10.0
libtpu: 0.0.40
codegen_flags: <defaults>
</compile_context>

<pallas_src>
import functools

import jax
import jax.numpy as jnp
from jax import lax
from jax.experimental import pallas as pl
from jax.experimental.pallas import tpu as pltpu

EPS = 1e-5


def _decoder_kernel(x_ref, w1_ref, w2_ref, w3_ref, mask_ref,
                    favg_h_ref, fbc_h_ref, favg_o_ref, fbc_o_ref, bn_ref,
                    o_ref, *, Ch, Cout, eps, compute_dtype):
    f32 = jnp.float32

    def bn_relu(pre, g, b, favg, fbc):
        """relu -> training-mode BatchNorm in the wide (R, W*C) layout.

        One M=2 matmul for [sum; sum_sq] -> (mu, E[x^2]) and one M=2 matmul
        for [scale; shift] broadcast, instead of four M=1 matmuls.
        """
        h = jnp.maximum(pre, 0.0)
        sums = jnp.concatenate(
            [jnp.sum(h, axis=0, keepdims=True),
             jnp.sum(h * h, axis=0, keepdims=True)], axis=0)         # (2, W*C)
        stats = jnp.dot(sums, favg, preferred_element_type=f32)      # (2, C)
        mu, ex2 = stats[0:1, :], stats[1:2, :]
        var = jnp.maximum(ex2 - mu * mu, 0.0)   # clamp: cancellation-prone
        scale = g * lax.rsqrt(var + eps)                              # (1, C)
        shift = b - mu * scale                                        # (1, C)
        ss = jnp.concatenate([scale, shift], axis=0)                  # (2, C)
        ssw = jnp.dot(ss, fbc, preferred_element_type=f32)            # (2, W*C)
        return h * ssw[0:1, :] + ssw[1:2, :]

    bn = bn_ref[...]
    g1, b1 = bn[0:1, :Ch], bn[1:2, :Ch]
    g2, b2 = bn[2:3, :Ch], bn[3:4, :Ch]
    g3, b3 = bn[4:5, :Cout], bn[5:6, :Cout]

    favg_h = favg_h_ref[...]
    fbc_h = fbc_h_ref[...]

    # ---- stage 1: 1x1 conv (dense kron matmul on MXU) -> relu -> bn ------
    pre1 = jnp.dot(x_ref[...], w1_ref[...], preferred_element_type=f32)
    h1 = bn_relu(pre1, g1, b1, favg_h, fbc_h)                 # (R, W*Ch) f32

    # ---- stage 2: 3x3 conv (pad=1) -> relu -> bn --------------------------
    # dy = -1 / +1 row taps via sublane roll (XLU) + 0/1 boundary-row masks
    # (VPU); dx taps are folded into the banded dy blocks of w2_ref.  Three
    # dots accumulate directly in f32 (no (R, 3*W*Ch) lane concat).
    R = h1.shape[0]
    m_up = mask_ref[:, 0:1]                                   # zero where y == 0
    m_dn = mask_ref[:, 1:2]                                   # zero where y == H-1
    a_up = pltpu.roll(h1, shift=1, axis=0) * m_up             # rows y-1, padded
    a_dn = pltpu.roll(h1, shift=R - 1, axis=0) * m_dn         # rows y+1, padded
    h1c = h1.astype(compute_dtype)
    pre2 = jnp.dot(a_up.astype(compute_dtype), w2_ref[0],
                   preferred_element_type=f32)
    pre2 += jnp.dot(h1c, w2_ref[1], preferred_element_type=f32)
    pre2 += jnp.dot(a_dn.astype(compute_dtype), w2_ref[2],
                    preferred_element_type=f32)
    h2 = bn_relu(pre2, g2, b2, favg_h, fbc_h)                 # (R, W*Ch) f32

    # ---- stage 3: residual add -> 1x1 conv -> relu -> bn ------------------
    pre3 = jnp.dot((h2 + h1).astype(compute_dtype), w3_ref[...],
                   preferred_element_type=f32)
    h3 = bn_relu(pre3, g3, b3, favg_o_ref[...], fbc_o_ref[...])   # (R, W*Cout)

    # lane-dense output store (W*Cout lanes -> dense vst).
    o_ref[...] = h3


def decoder_block(x_nchw, w1, w2, w3, g1, b1, g2, b2, g3, b3,
                  compute_dtype=jnp.bfloat16):
    """PyTorch-convention inputs: x NCHW, conv weights OIHW, BN params (C,)."""
    f32 = jnp.float32
    cdt = compute_dtype
    N, Cin, H, W = x_nchw.shape
    Ch = w1.shape[0]
    Cout = w3.shape[0]
    R = N * H
    M = N * H * W

    # ---- activations: NCHW -> lane-dense (N*H, W*Cin), bf16 MXU operand ---
    x_wide = (jnp.transpose(x_nchw, (0, 2, 3, 1))
              .reshape(R, W * Cin).astype(cdt))

    # ---- weights: fold the 1x1 / 3x3 convs into dense block matmuls -------
    w1k = jnp.transpose(w1[:, :, 0, 0], (1, 0)).astype(f32)        # (Cin, Ch)
    w3k = jnp.transpose(w3[:, :, 0, 0], (1, 0)).astype(f32)        # (Ch, Cout)
    w2k = jnp.transpose(w2, (2, 3, 1, 0)).astype(f32)              # (ky,kx,Ci,Co)

    eye_w = jnp.eye(W, dtype=f32)
    w1b = jnp.kron(eye_w, w1k).astype(cdt)                   # (W*Cin, W*Ch)
    w3b = jnp.kron(eye_w, w3k).astype(cdt)                   # (W*Ch, W*Cout)

    # TODO(synk): the kron/banded blocks scale as W^2*C^2; above roughly
    # W*C ~ 256-512 switch the 1x1 stages to plain (N*H*W, C)x(C, C') matmuls
    # and/or tile the W axis (hard VMEM wall on v7x at realistic shapes).

    # Banded 3x3 weight as a (3, W*Ch, W*Ch) stack over dy in (-1, 0, +1);
    # B_dy[x*Ch+ci, x'*Ch+co] = w2[ky=dy+1, kx=(x-x')+1, ci, co].
    xs = jnp.arange(W)
    dy_blocks = []
    for dy in (-1, 0, 1):
        blk = jnp.zeros((W * Ch, W * Ch), f32)
        for dx in (-1, 0, 1):
            d_dx = (xs[:, None] - xs[None, :] == dx).astype(f32)
            blk = blk + jnp.kron(d_dx, w2k[dy + 1, dx + 1])
        dy_blocks.append(blk)
    w2b = jnp.stack(dy_blocks, axis=0).astype(cdt)           # (3, W*Ch, W*Ch)

    # 0/1 boundary-row masks for the dy = -1 / +1 sublane rolls (zero-padding
    # rows and batch-image boundaries); replaces the old (2, R, R) matmuls.
    ys = jnp.arange(R) % H
    masks = jnp.stack([(ys > 0).astype(f32),
                       (ys < H - 1).astype(f32)], axis=1)    # (R, 2)

    # ---- BatchNorm fold / broadcast matrices (kept f32 for stat accuracy) -
    favg_h = jnp.tile(jnp.eye(Ch, dtype=f32), (W, 1)) / M    # (W*Ch, Ch)
    fbc_h = jnp.tile(jnp.eye(Ch, dtype=f32), (1, W))         # (Ch, W*Ch)
    favg_o = jnp.tile(jnp.eye(Cout, dtype=f32), (W, 1)) / M  # (W*Cout, Cout)
    fbc_o = jnp.tile(jnp.eye(Cout, dtype=f32), (1, W))       # (Cout, W*Cout)

    # Pack the six BN params into a single (6, Cmax) input.
    cmax = max(Ch, Cout)

    def _row(v):
        v = v.astype(f32)
        return jnp.pad(v, (0, cmax - v.shape[0]))

    bn_pack = jnp.stack([_row(g1), _row(b1), _row(g2), _row(b2),
                         _row(g3), _row(b3)], axis=0)        # (6, cmax)

    kernel = functools.partial(_decoder_kernel, Ch=Ch, Cout=Cout, eps=EPS,
                               compute_dtype=cdt)
    vmem_spec = pl.BlockSpec(memory_space=pltpu.MemorySpace.VMEM)

    in_arrays = (x_wide, w1b, w2b, w3b, masks,
                 favg_h, fbc_h, favg_o, fbc_o, bn_pack)

    # ---- cost estimate (quadratic shift term removed) ---------------------
    mm_flops = 2 * R * (W * Cin) * (W * Ch)                  # stage 1
    mm_flops += 3 * 2 * R * (W * Ch) * (W * Ch)              # stage 2 (3 dy dots)
    mm_flops += 2 * R * (W * Ch) * (W * Cout)                # stage 3
    mm_flops += 2 * 8 * (W * Ch) * Ch + 8 * (W * Cout) * Cout    # BN fold/bcast
    ew_flops = 16 * R * W * Ch + 6 * R * W * Cout
    in_bytes = sum(int(a.size) * a.dtype.itemsize for a in in_arrays)
    out_bytes = 4 * R * W * Cout
    cost = pl.CostEstimate(flops=int(mm_flops + ew_flops),
                           transcendentals=int(2 * Ch + Cout),
                           bytes_accessed=int(in_bytes + out_bytes))

    # ---- VMEM budget derived from live buffers, capped ~60 MiB (v7x) ------
    interm_bytes = 4 * (6 * R * W * Ch + 3 * R * W * Cout)
    vmem_limit = int(min(60 * 2 ** 20,
                         max(8 * 2 ** 20,
                             2 * (in_bytes + out_bytes + interm_bytes))))

    out_wide = pl.pallas_call(
        kernel,
        out_shape=jax.ShapeDtypeStruct((R, W * Cout), f32),
        in_specs=[vmem_spec] * len(in_arrays),
        out_specs=vmem_spec,
        compiler_params=pltpu.CompilerParams(vmem_limit_bytes=vmem_limit),
        cost_estimate=cost,
    )(*in_arrays)

    # TODO(synk): for large N*H*W (v7x 64 MiB VMEM / two TensorCores), add a
    # row-tiled grid over N*H blocks with a two-phase BN (stats-accumulate +
    # normalize) and dimension_semantics=('parallel',) to split rows across
    # cores; the single-VMEM-block design here is sized for small shapes.
    out_nhwc = out_wide.reshape(N, H, W, Cout)
    return jnp.transpose(out_nhwc, (0, 3, 1, 2))


# ------------------------- pure-JAX reference ---------------------------
def _reference(x, w1, w2, w3, g1, b1, g2, b2, g3, b3):
    def conv(x, w, pad):
        return lax.conv_general_dilated(
            x, w, (1, 1), [(pad, pad), (pad, pad)],
            dimension_numbers=('NCHW', 'OIHW', 'NCHW'),
            precision=lax.Precision.HIGHEST)

    def bn(x, g, b):
        mu = jnp.mean(x, axis=(0, 2, 3), keepdims=True)
        var = jnp.mean((x - mu) ** 2, axis=(0, 2, 3), keepdims=True)
        return ((x - mu) / jnp.sqrt(var + EPS)) * g.reshape(1, -1, 1, 1) \
            + b.reshape(1, -1, 1, 1)

    h1 = bn(jnp.maximum(conv(x, w1, 0), 0.0), g1, b1)
    h2 = bn(jnp.maximum(conv(h1, w2, 1), 0.0), g2, b2)
    h3 = bn(jnp.maximum(conv(h2 + h1, w3, 0), 0.0), g3, b3)
    return h3


if __name__ == "__main__":
    # Small, module-consistent shapes (x: NCHW = [2, 4, 16, 16]).
    N, Cin, Ch, Cout, H, W = 2, 4, 8, 16, 16, 16

    key = jax.random.PRNGKey(0)
    ks = jax.random.split(key, 10)
    x = jax.random.normal(ks[0], (N, Cin, H, W), jnp.float32)

    # Deterministic synthetic parameters (conv weights OIHW, BN params (C,)).
    w1 = 0.3 * jax.random.normal(ks[1], (Ch, Cin, 1, 1), jnp.float32)
    w2 = 0.1 * jax.random.normal(ks[2], (Ch, Ch, 3, 3), jnp.float32)
    w3 = 0.2 * jax.random.normal(ks[3], (Cout, Ch, 1, 1), jnp.float32)
    g1 = 1.0 + 0.1 * jax.random.normal(ks[4], (Ch,), jnp.float32)
    b1 = 0.1 * jax.random.normal(ks[5], (Ch,), jnp.float32)
    g2 = 1.0 + 0.1 * jax.random.normal(ks[6], (Ch,), jnp.float32)
    b2 = 0.1 * jax.random.normal(ks[7], (Ch,), jnp.float32)
    g3 = 1.0 + 0.1 * jax.random.normal(ks[8], (Cout,), jnp.float32)
    b3 = 0.1 * jax.random.normal(ks[9], (Cout,), jnp.float32)

    out = decoder_block(x, w1, w2, w3, g1, b1, g2, b2, g3, b3)
    out = jax.block_until_ready(out)

    ref = _reference(x, w1, w2, w3, g1, b1, g2, b2, g3, b3)
    assert out.shape == (N, Cout, H, W)
    max_err = float(jnp.max(jnp.abs(out - ref)))
    # bf16 MXU operands with f32 accumulation across a 3-stage conv/BN chain:
    # tolerance set for bf16 input rounding (f32 reference uses HIGHEST).
    assert jnp.allclose(out, ref, atol=5e-2, rtol=5e-2), max_err

    print("KERNEL_OK")
</pallas_src>

<mosaic_0001>
module attributes {stable_mosaic.version = 11 : i64} {
  func.func @_decoder_kernel(%arg0: memref<32x64xbf16, #tpu.memory_space<vmem>>, %arg1: memref<64x128xbf16, #tpu.memory_space<vmem>>, %arg2: memref<3x128x128xbf16, #tpu.memory_space<vmem>>, %arg3: memref<128x256xbf16, #tpu.memory_space<vmem>>, %arg4: memref<32x2xf32, #tpu.memory_space<vmem>>, %arg5: memref<128x8xf32, #tpu.memory_space<vmem>>, %arg6: memref<8x128xf32, #tpu.memory_space<vmem>>, %arg7: memref<256x16xf32, #tpu.memory_space<vmem>>, %arg8: memref<16x256xf32, #tpu.memory_space<vmem>>, %arg9: memref<6x16xf32, #tpu.memory_space<vmem>>, %arg10: memref<32x256xf32, #tpu.memory_space<vmem>>) attributes {dimension_semantics = [], scalar_prefetch = 0 : i64, scratch_operands = 0 : i64, tpu.core_type = #tpu.core_type<tc>} {
    %c0 = arith.constant 0 : index
    %c0_0 = arith.constant 0 : index
    %0 = vector.load %arg9[%c0, %c0_0] : memref<6x16xf32, #tpu.memory_space<vmem>>, vector<6x16xf32>
    %1 = vector.extract_strided_slice %0 {offsets = [0, 0], sizes = [1, 8], strides = [1, 1]} : vector<6x16xf32> to vector<1x8xf32>
    %2 = vector.extract_strided_slice %0 {offsets = [1, 0], sizes = [1, 8], strides = [1, 1]} : vector<6x16xf32> to vector<1x8xf32>
    %3 = vector.extract_strided_slice %0 {offsets = [2, 0], sizes = [1, 8], strides = [1, 1]} : vector<6x16xf32> to vector<1x8xf32>
    %4 = vector.extract_strided_slice %0 {offsets = [3, 0], sizes = [1, 8], strides = [1, 1]} : vector<6x16xf32> to vector<1x8xf32>
    %5 = vector.extract_strided_slice %0 {offsets = [4, 0], sizes = [1, 16], strides = [1, 1]} : vector<6x16xf32> to vector<1x16xf32>
    %6 = vector.extract_strided_slice %0 {offsets = [5, 0], sizes = [1, 16], strides = [1, 1]} : vector<6x16xf32> to vector<1x16xf32>
    %c0_1 = arith.constant 0 : index
    %c0_2 = arith.constant 0 : index
    %7 = vector.load %arg5[%c0_1, %c0_2] : memref<128x8xf32, #tpu.memory_space<vmem>>, vector<128x8xf32>
    %c0_3 = arith.constant 0 : index
    %c0_4 = arith.constant 0 : index
    %8 = vector.load %arg6[%c0_3, %c0_4] : memref<8x128xf32, #tpu.memory_space<vmem>>, vector<8x128xf32>
    %c0_5 = arith.constant 0 : index
    %c0_6 = arith.constant 0 : index
    %9 = vector.load %arg0[%c0_5, %c0_6] : memref<32x64xbf16, #tpu.memory_space<vmem>>, vector<32x64xbf16>
    %c0_7 = arith.constant 0 : index
    %c0_8 = arith.constant 0 : index
    %10 = vector.load %arg1[%c0_7, %c0_8] : memref<64x128xbf16, #tpu.memory_space<vmem>>, vector<64x128xbf16>
    %cst = arith.constant dense<0.000000e+00> : vector<32x128xf32>
    %11 = tpu.matmul %9, %10, %cst {dimension_numbers = #tpu.dot_dimension_numbers<[1], [0], [0], [1], [0, 0, 1, 1], [], []>} : vector<32x64xbf16>, vector<64x128xbf16>, vector<32x128xf32> -> vector<32x128xf32>
    %cst_9 = arith.constant 0.000000e+00 : f32
    %12 = vector.broadcast %cst_9 : f32 to vector<32x128xf32>
    %13 = arith.maximumf %11, %12 : vector<32x128xf32>
    %cst_10 = arith.constant dense<0.000000e+00> : vector<128xf32>
    %14 = vector.multi_reduction <add>, %13, %cst_10 [0] : vector<32x128xf32> to vector<128xf32>
    %15 = vector.shape_cast %14 : vector<128xf32> to vector<1x128xf32>
    %16 = arith.mulf %13, %13 : vector<32x128xf32>
    %cst_11 = arith.constant dense<0.000000e+00> : vector<128xf32>
    %17 = vector.multi_reduction <add>, %16, %cst_11 [0] : vector<32x128xf32> to vector<128xf32>
    %18 = vector.shape_cast %17 : vector<128xf32> to vector<1x128xf32>
    %19 = tpu.concatenate %15, %18 in 0 : vector<1x128xf32>, vector<1x128xf32> -> vector<2x128xf32>
    %cst_12 = arith.constant dense<0.000000e+00> : vector<2x8xf32>
    %20 = tpu.matmul %19, %7, %cst_12 {dimension_numbers = #tpu.dot_dimension_numbers<[1], [0], [0], [1], [0, 0, 1, 1], [], []>} : vector<2x128xf32>, vector<128x8xf32>, vector<2x8xf32> -> vector<2x8xf32>
    %21 = vector.extract_strided_slice %20 {offsets = [0, 0], sizes = [1, 8], strides = [1, 1]} : vector<2x8xf32> to vector<1x8xf32>
    %22 = vector.extract_strided_slice %20 {offsets = [1, 0], sizes = [1, 8], strides = [1, 1]} : vector<2x8xf32> to vector<1x8xf32>
    %23 = arith.mulf %21, %21 : vector<1x8xf32>
    %24 = arith.subf %22, %23 : vector<1x8xf32>
    %cst_13 = arith.constant 0.000000e+00 : f32
    %25 = vector.broadcast %cst_13 : f32 to vector<1x8xf32>
    %26 = arith.maximumf %24, %25 : vector<1x8xf32>
    %cst_14 = arith.constant 9.99999974E-6 : f32
    %27 = vector.broadcast %cst_14 : f32 to vector<1x8xf32>
    %28 = arith.addf %26, %27 : vector<1x8xf32>
    %29 = math.rsqrt %28 : vector<1x8xf32>
    %30 = arith.mulf %1, %29 : vector<1x8xf32>
    %31 = arith.mulf %21, %30 : vector<1x8xf32>
    %32 = arith.subf %2, %31 : vector<1x8xf32>
    %33 = tpu.concatenate %30, %32 in 0 : vector<1x8xf32>, vector<1x8xf32> -> vector<2x8xf32>
    %cst_15 = arith.constant dense<0.000000e+00> : vector<2x128xf32>
    %34 = tpu.matmul %33, %8, %cst_15 {dimension_numbers = #tpu.dot_dimension_numbers<[1], [0], [0], [1], [0, 0, 1, 1], [], []>} : vector<2x8xf32>, vector<8x128xf32>, vector<2x128xf32> -> vector<2x128xf32>
    %35 = vector.extract_strided_slice %34 {offsets = [0, 0], sizes = [1, 128], strides = [1, 1]} : vector<2x128xf32> to vector<1x128xf32>
    %36 = vector.broadcast %35 : vector<1x128xf32> to vector<32x128xf32>
    %37 = arith.mulf %13, %36 : vector<32x128xf32>
    %38 = vector.extract_strided_slice %34 {offsets = [1, 0], sizes = [1, 128], strides = [1, 1]} : vector<2x128xf32> to vector<1x128xf32>
    %39 = vector.broadcast %38 : vector<1x128xf32> to vector<32x128xf32>
    %40 = arith.addf %37, %39 : vector<32x128xf32>
    %c0_16 = arith.constant 0 : index
    %c0_17 = arith.constant 0 : index
    %41 = vector.load %arg4[%c0_16, %c0_17] : memref<32x2xf32, #tpu.memory_space<vmem>>, vector<32x1xf32>
    %c0_18 = arith.constant 0 : index
    %c1 = arith.constant 1 : index
    %42 = vector.load %arg4[%c0_18, %c1] : memref<32x2xf32, #tpu.memory_space<vmem>>, vector<32x1xf32>
    %c1_i32 = arith.constant 1 : i32
    %43 = tpu.dynamic_rotate %40 by %c1_i32 dim 0 : vector<32x128xf32>, i32 -> vector<32x128xf32>
    %44 = vector.broadcast %41 : vector<32x1xf32> to vector<32x128xf32>
    %45 = arith.mulf %43, %44 : vector<32x128xf32>
    %c31_i32 = arith.constant 31 : i32
    %46 = tpu.dynamic_rotate %40 by %c31_i32 dim 0 : vector<32x128xf32>, i32 -> vector<32x128xf32>
    %47 = vector.broadcast %42 : vector<32x1xf32> to vector<32x128xf32>
    %48 = arith.mulf %46, %47 : vector<32x128xf32>
    %49 = arith.truncf %40 : vector<32x128xf32> to vector<32x128xbf16>
    %50 = arith.truncf %45 : vector<32x128xf32> to vector<32x128xbf16>
    %c0_19 = arith.constant 0 : index
    %c0_20 = arith.constant 0 : index
    %c0_21 = arith.constant 0 : index
    %51 = vector.load %arg2[%c0_19, %c0_20, %c0_21] : memref<3x128x128xbf16, #tpu.memory_space<vmem>>, vector<1x128x128xbf16>
    %52 = vector.shape_cast %51 : vector<1x128x128xbf16> to vector<128x128xbf16>
    %cst_22 = arith.constant dense<0.000000e+00> : vector<32x128xf32>
    %53 = tpu.matmul %50, %52, %cst_22 {dimension_numbers = #tpu.dot_dimension_numbers<[1], [0], [0], [1], [0, 0, 1, 1], [], []>} : vector<32x128xbf16>, vector<128x128xbf16>, vector<32x128xf32> -> vector<32x128xf32>
    %c1_23 = arith.constant 1 : index
    %c0_24 = arith.constant 0 : index
    %c0_25 = arith.constant 0 : index
    %54 = vector.load %arg2[%c1_23, %c0_24, %c0_25] : memref<3x128x128xbf16, #tpu.memory_space<vmem>>, vector<1x128x128xbf16>
    %55 = vector.shape_cast %54 : vector<1x128x128xbf16> to vector<128x128xbf16>
    %cst_26 = arith.constant dense<0.000000e+00> : vector<32x128xf32>
    %56 = tpu.matmul %49, %55, %cst_26 {dimension_numbers = #tpu.dot_dimension_numbers<[1], [0], [0], [1], [0, 0, 1, 1], [], []>} : vector<32x128xbf16>, vector<128x128xbf16>, vector<32x128xf32> -> vector<32x128xf32>
    %57 = arith.addf %53, %56 : vector<32x128xf32>
    %58 = arith.truncf %48 : vector<32x128xf32> to vector<32x128xbf16>
    %c2 = arith.constant 2 : index
    %c0_27 = arith.constant 0 : index
    %c0_28 = arith.constant 0 : index
    %59 = vector.load %arg2[%c2, %c0_27, %c0_28] : memref<3x128x128xbf16, #tpu.memory_space<vmem>>, vector<1x128x128xbf16>
    %60 = vector.shape_cast %59 : vector<1x128x128xbf16> to vector<128x128xbf16>
    %cst_29 = arith.constant dense<0.000000e+00> : vector<32x128xf32>
    %61 = tpu.matmul %58, %60, %cst_29 {dimension_numbers = #tpu.dot_dimension_numbers<[1], [0], [0], [1], [0, 0, 1, 1], [], []>} : vector<32x128xbf16>, vector<128x128xbf16>, vector<32x128xf32> -> vector<32x128xf32>
    %62 = arith.addf %57, %61 : vector<32x128xf32>
    %cst_30 = arith.constant 0.000000e+00 : f32
    %63 = vector.broadcast %cst_30 : f32 to vector<32x128xf32>
    %64 = arith.maximumf %62, %63 : vector<32x128xf32>
    %cst_31 = arith.constant dense<0.000000e+00> : vector<128xf32>
    %65 = vector.multi_reduction <add>, %64, %cst_31 [0] : vector<32x128xf32> to vector<128xf32>
    %66 = vector.shape_cast %65 : vector<128xf32> to vector<1x128xf32>
    %67 = arith.mulf %64, %64 : vector<32x128xf32>
    %cst_32 = arith.constant dense<0.000000e+00> : vector<128xf32>
    %68 = vector.multi_reduction <add>, %67, %cst_32 [0] : vector<32x128xf32> to vector<128xf32>
    %69 = vector.shape_cast %68 : vector<128xf32> to vector<1x128xf32>
    %70 = tpu.concatenate %66, %69 in 0 : vector<1x128xf32>, vector<1x128xf32> -> vector<2x128xf32>
    %cst_33 = arith.constant dense<0.000000e+00> : vector<2x8xf32>
    %71 = tpu.matmul %70, %7, %cst_33 {dimension_numbers = #tpu.dot_dimension_numbers<[1], [0], [0], [1], [0, 0, 1, 1], [], []>} : vector<2x128xf32>, vector<128x8xf32>, vector<2x8xf32> -> vector<2x8xf32>
    %72 = vector.extract_strided_slice %71 {offsets = [0, 0], sizes = [1, 8], strides = [1, 1]} : vector<2x8xf32> to vector<1x8xf32>
    %73 = vector.extract_strided_slice %71 {offsets = [1, 0], sizes = [1, 8], strides = [1, 1]} : vector<2x8xf32> to vector<1x8xf32>
    %74 = arith.mulf %72, %72 : vector<1x8xf32>
    %75 = arith.subf %73, %74 : vector<1x8xf32>
    %cst_34 = arith.constant 0.000000e+00 : f32
    %76 = vector.broadcast %cst_34 : f32 to vector<1x8xf32>
    %77 = arith.maximumf %75, %76 : vector<1x8xf32>
    %cst_35 = arith.constant 9.99999974E-6 : f32
    %78 = vector.broadcast %cst_35 : f32 to vector<1x8xf32>
    %79 = arith.addf %77, %78 : vector<1x8xf32>
    %80 = math.rsqrt %79 : vector<1x8xf32>
    %81 = arith.mulf %3, %80 : vector<1x8xf32>
    %82 = arith.mulf %72, %81 : vector<1x8xf32>
    %83 = arith.subf %4, %82 : vector<1x8xf32>
    %84 = tpu.concatenate %81, %83 in 0 : vector<1x8xf32>, vector<1x8xf32> -> vector<2x8xf32>
    %cst_36 = arith.constant dense<0.000000e+00> : vector<2x128xf32>
    %85 = tpu.matmul %84, %8, %cst_36 {dimension_numbers = #tpu.dot_dimension_numbers<[1], [0], [0], [1], [0, 0, 1, 1], [], []>} : vector<2x8xf32>, vector<8x128xf32>, vector<2x128xf32> -> vector<2x128xf32>
    %86 = vector.extract_strided_slice %85 {offsets = [0, 0], sizes = [1, 128], strides = [1, 1]} : vector<2x128xf32> to vector<1x128xf32>
    %87 = vector.broadcast %86 : vector<1x128xf32> to vector<32x128xf32>
    %88 = arith.mulf %64, %87 : vector<32x128xf32>
    %89 = vector.extract_strided_slice %85 {offsets = [1, 0], sizes = [1, 128], strides = [1, 1]} : vector<2x128xf32> to vector<1x128xf32>
    %90 = vector.broadcast %89 : vector<1x128xf32> to vector<32x128xf32>
    %91 = arith.addf %88, %90 : vector<32x128xf32>
    %92 = arith.addf %91, %40 : vector<32x128xf32>
    %93 = arith.truncf %92 : vector<32x128xf32> to vector<32x128xbf16>
    %c0_37 = arith.constant 0 : index
    %c0_38 = arith.constant 0 : index
    %94 = vector.load %arg3[%c0_37, %c0_38] : memref<128x256xbf16, #tpu.memory_space<vmem>>, vector<128x256xbf16>
    %cst_39 = arith.constant dense<0.000000e+00> : vector<32x256xf32>
    %95 = tpu.matmul %93, %94, %cst_39 {dimension_numbers = #tpu.dot_dimension_numbers<[1], [0], [0], [1], [0, 0, 1, 1], [], []>} : vector<32x128xbf16>, vector<128x256xbf16>, vector<32x256xf32> -> vector<32x256xf32>
    %c0_40 = arith.constant 0 : index
    %c0_41 = arith.constant 0 : index
    %96 = vector.load %arg7[%c0_40, %c0_41] : memref<256x16xf32, #tpu.memory_space<vmem>>, vector<256x16xf32>
    %c0_42 = arith.constant 0 : index
    %c0_43 = arith.constant 0 : index
    %97 = vector.load %arg8[%c0_42, %c0_43] : memref<16x256xf32, #tpu.memory_space<vmem>>, vector<16x256xf32>
    %cst_44 = arith.constant 0.000000e+00 : f32
    %98 = vector.broadcast %cst_44 : f32 to vector<32x256xf32>
    %99 = arith.maximumf %95, %98 : vector<32x256xf32>
    %cst_45 = arith.constant dense<0.000000e+00> : vector<256xf32>
    %100 = vector.multi_reduction <add>, %99, %cst_45 [0] : vector<32x256xf32> to vector<256xf32>
    %101 = vector.shape_cast %100 : vector<256xf32> to vector<1x256xf32>
    %102 = arith.mulf %99, %99 : vector<32x256xf32>
    %cst_46 = arith.constant dense<0.000000e+00> : vector<256xf32>
    %103 = vector.multi_reduction <add>, %102, %cst_46 [0] : vector<32x256xf32> to vector<256xf32>
    %104 = vector.shape_cast %103 : vector<256xf32> to vector<1x256xf32>
    %105 = tpu.concatenate %101, %104 in 0 : vector<1x256xf32>, vector<1x256xf32> -> vector<2x256xf32>
    %cst_47 = arith.constant dense<0.000000e+00> : vector<2x16xf32>
    %106 = tpu.matmul %105, %96, %cst_47 {dimension_numbers = #tpu.dot_dimension_numbers<[1], [0], [0], [1], [0, 0, 1, 1], [], []>} : vector<2x256xf32>, vector<256x16xf32>, vector<2x16xf32> -> vector<2x16xf32>
    %107 = vector.extract_strided_slice %106 {offsets = [0, 0], sizes = [1, 16], strides = [1, 1]} : vector<2x16xf32> to vector<1x16xf32>
    %108 = vector.extract_strided_slice %106 {offsets = [1, 0], sizes = [1, 16], strides = [1, 1]} : vector<2x16xf32> to vector<1x16xf32>
    %109 = arith.mulf %107, %107 : vector<1x16xf32>
    %110 = arith.subf %108, %109 : vector<1x16xf32>
    %cst_48 = arith.constant 0.000000e+00 : f32
    %111 = vector.broadcast %cst_48 : f32 to vector<1x16xf32>
    %112 = arith.maximumf %110, %111 : vector<1x16xf32>
    %cst_49 = arith.constant 9.99999974E-6 : f32
    %113 = vector.broadcast %cst_49 : f32 to vector<1x16xf32>
    %114 = arith.addf %112, %113 : vector<1x16xf32>
    %115 = math.rsqrt %114 : vector<1x16xf32>
    %116 = arith.mulf %5, %115 : vector<1x16xf32>
    %117 = arith.mulf %107, %116 : vector<1x16xf32>
    %118 = arith.subf %6, %117 : vector<1x16xf32>
    %119 = tpu.concatenate %116, %118 in 0 : vector<1x16xf32>, vector<1x16xf32> -> vector<2x16xf32>
    %cst_50 = arith.constant dense<0.000000e+00> : vector<2x256xf32>
    %120 = tpu.matmul %119, %97, %cst_50 {dimension_numbers = #tpu.dot_dimension_numbers<[1], [0], [0], [1], [0, 0, 1, 1], [], []>} : vector<2x16xf32>, vector<16x256xf32>, vector<2x256xf32> -> vector<2x256xf32>
    %121 = vector.extract_strided_slice %120 {offsets = [0, 0], sizes = [1, 256], strides = [1, 1]} : vector<2x256xf32> to vector<1x256xf32>
    %122 = vector.broadcast %121 : vector<1x256xf32> to vector<32x256xf32>
    %123 = arith.mulf %99, %122 : vector<32x256xf32>
    %124 = vector.extract_strided_slice %120 {offsets = [1, 0], sizes = [1, 256], strides = [1, 1]} : vector<2x256xf32> to vector<1x256xf32>
    %125 = vector.broadcast %124 : vector<1x256xf32> to vector<32x256xf32>
    %126 = arith.addf %123, %125 : vector<32x256xf32>
    %c0_51 = arith.constant 0 : index
    %c0_52 = arith.constant 0 : index
    %127 = vector.load %arg10[%c0_51, %c0_52] : memref<32x256xf32, #tpu.memory_space<vmem>>, vector<32x256xf32>
    tpu.vector_store %arg10[%c0_51, %c0_52], %126 {strides = array<i32>} : memref<32x256xf32, #tpu.memory_space<vmem>>, vector<32x256xf32>,
    return
  }
}

</mosaic_0001>

<bundles_post_ra>
// kernel: tpu_custom_call.1
= control target key start
LH: loop header
LB: loop body
LE: loop exit
PB: predicated region body
PF: predicated region fallthrough
CT: control target
= control target key end

     0   :  { %v1994_v2 = vmov 0.0|0.0   ;;  %vm101_vm0 = vcmask 523264   ;;  %s2616_s0 = inlined_call_operand.vmem [shape: bf16[32,64], index: 0, kind: input, shape index: {}]   ;;  %s2617_s1 = inlined_call_operand.vmem [shape: bf16[64,128], index: 1, kind: input, shape index: {}]   ;;  %s2618_s2 = inlined_call_operand.vmem [shape: bf16[3,128,128], index: 2, kind: input, shape index: {}]   ;;  %s2619_s3 = inlined_call_operand.vmem [shape: bf16[128,256], index: 3, kind: input, shape index: {}]   ;;  %s2620_s4 = inlined_call_operand.vmem [shape: f32[32,2], index: 4, kind: input, shape index: {}]   ;;  %s2621_s5 = inlined_call_operand.vmem [shape: f32[128,8], index: 5, kind: input, shape index: {}]   ;;  %s2622_s6 = inlined_call_operand.vmem [shape: f32[8,128], index: 6, kind: input, shape index: {}]   ;;  %s2623_s7 = inlined_call_operand.vmem [shape: f32[256,16], index: 7, kind: input, shape index: {}]   ;;  %s2624_s8 = inlined_call_operand.vmem [shape: f32[16,256], index: 8, kind: input, shape index: {}]   ;;  %s2625_s9 = inlined_call_operand.vmem [shape: f32[6,16], index: 9, kind: input, shape index: {}]   ;;  %s2626_s10 = inlined_call_operand.hbm [shape: f32[32,256], index: 10, kind: output, shape index: {}]  }
   0x1   :  { %v1910_v0 = vld [vmem:[%s2617_s1] sm:$0xff]   ;;  %v1911_v1 = vld [vmem:[%s2617_s1 + $0x8] sm:$0xff]   ;;  %1806 = vmatprep.subr.bf16.mxu1 %v1994_v2  ;;  %v1912_v3 = vld [vmem:[%s2617_s1 + $0x10] sm:$0xff]  }
   0x2   :  { %1654 = vmatprep.subr.bf16.mxu0 %v1910_v0  ;;  %v1914_v4 = vld [vmem:[%s2616_s0] sm:$0xff]   ;;  %v1913_v5 = vld [vmem:[%s2617_s1 + $0x18] sm:$0xff]   ;;  %v39_v7 = vld [vmem:[%s2621_s5 + $0x8] sm:$0xff] }
   0x3   :  { %1655 = vmatpush3.bf16.msra.mxu0 %v1910_v0  ;;  %1662 = vmatprep.mubr.msk.bf16.mxu0 %vm101_vm0, %v1914_v4  ;;  %v38_v6 = vld [vmem:[%s2621_s5] sm:$0xff]  ;;  %v1915_v9 = vld [vmem:[%s2616_s0 + $0x8] sm:$0xff]  }
   0x4   :  { %1656 = vmatprep.subr.bf16.mxu0 %v1911_v1  ;;  %v2080_v8 = vpack.c.bf16 %v39_v7, %v38_v6 }
   0x6   :  { %1808 = vmatpush3.bf16.msra.mxu1 %v2080_v8 }
   0x7   :  { %1657 = vmatpush3.bf16.msra.mxu0 %v1911_v1  ;;  %1809 = vmatprep.subr.bf16.mxu1 %v1994_v2 }
   0x8   :  { %1658 = vmatprep.subr.bf16.mxu0 %v1912_v3 }
   0xb   :  { %1659 = vmatpush3.bf16.msra.mxu0 %v1912_v3 }
   0xc   :  { %1660 = vmatprep.subr.bf16.mxu0 %v1913_v5 }
   0xf   :  { %1661 = vmatpush3.bf16.msra.mxu0 %v1913_v5 }
  0x12   :  { %1663 = vmatmul.mubr.msk.bf16.vlgmr.msra.gmra.mrb[0].mxu0 %vm101_vm0, %v1915_v9 }
  0x13   :  { %15 = vsyncpa [#allocation3], 0  ;;  %v40_v10 = vld [vmem:[%s2621_s5 + $0x10] sm:$0xff]  ;;  %v41_v11 = vld [vmem:[%s2621_s5 + $0x18] sm:$0xff]  ;;  %vm1995_vm1 = vmmov 0   ;;  %v1996_v27 = vmov 0.0  }
  0x14   :  { %v2094_v12 = vpack.c.bf16 %v41_v11, %v40_v10  ;;  %v42_v13 = vld [vmem:[%s2621_s5 + $0x20] sm:$0xff]  ;;  %v43_v14 = vld [vmem:[%s2621_s5 + $0x28] sm:$0xff]  ;;  %v44_v16 = vld [vmem:[%s2621_s5 + $0x30] sm:$0xff]  ;;  %1698 = vmatprep.mubr.msk.f32.mxu1 %vm1995_vm1, %v1996_v27  ;;  %1701 = vmatprep.subr.mxu0 %v1996_v27  ;;  %vm183_vm2 = vcmask 1040384   ;;  %v1997_v3 = vmov 0   ;;  %v1998_v6 = vmov 1  }
  0x15   :  { %v2104_v15 = vpack.c.bf16 %v43_v14, %v42_v13  ;;  %v45_v17 = vld [vmem:[%s2621_s5 + $0x38] sm:$0xff]  ;;  %v46_v19 = vld [vmem:[%s2621_s5 + $0x40] sm:$0xff]  ;;  %v47_v20 = vld [vmem:[%s2621_s5 + $0x48] sm:$0xff]  ;;  %1703 = vmatprep.mubr.msk.f32.mxu0 %vm1995_vm1, %v1996_v27  ;;  %1907 = vset.pattern.permute.xlu1 %v1997_v3  ;;  %vm273_vm3 = vcmask 64512   ;;  %vm1331_vm6 = vcmask 130048  }
  0x16   :  { %1811 = vmatpush3.bf16.msra.mxu1 %v2094_v12  ;;  %v2114_v18 = vpack.c.bf16 %v45_v17, %v44_v16  ;;  %v2124_v21 = vpack.c.bf16 %v47_v20, %v46_v19  ;;  %v48_v22 = vld [vmem:[%s2621_s5 + $0x50] sm:$0xff]  ;;  %v49_v23 = vld [vmem:[%s2621_s5 + $0x58] sm:$0xff]  ;;  %v50_v25 = vld [vmem:[%s2621_s5 + $0x60] sm:$0xff]  ;;  %1906 = vset.pattern.permute.xlu0 %v1997_v3 }
  0x17   :  { %1812 = vmatprep.subr.bf16.mxu1 %v1994_v2  ;;  %v1822_v24 = vpack.c.bf16 %v49_v23, %v48_v22  ;;  %v51_v26 = vld [vmem:[%s2621_s5 + $0x68] sm:$0xff]  ;;  %v52_v29 = vld [vmem:[%s2621_s5 + $0x70] sm:$0xff]  ;;  %v53_v30 = vld [vmem:[%s2621_s5 + $0x78] sm:$0xff] }
  0x18   :  { %v1825_v28 = vpack.c.bf16 %v51_v26, %v50_v25  ;;  %v1828_v31 = vpack.c.bf16 %v53_v30, %v52_v29  ;;  %v2193_v63 = vld [vmem:[%s2622_s6] sm:$0xff]  ;;  %v365_v0 = vld [vmem:[%s2620_s4 + $0x10] sm:$0xff]  ;;  %v366_v4 = vld [vmem:[%s2620_s4 + $0x18] sm:$0xff] }
  0x19   :  { %1702 = vmatpush3.msra.mxu0 %v2193_v63  ;;  %v363_v1 = vld [vmem:[%s2620_s4] sm:$0xff]  ;;  %390 = vperm.xlu1 %1907, %v365_v0   ;;  %v364_v5 = vld [vmem:[%s2620_s4 + $0x8] sm:$0xff]  ;;  %v1918_v23 = vld [vmem:[%s2618_s2 + $0x50] sm:$0xff]  }
  0x1a   :  { %1814 = vmatpush3.bf16.msra.mxu1 %v2104_v15  ;;  %380 = vperm.xlu0 %1906, %v363_v1   ;;  %v1920_v25 = vld [vmem:[%s2618_s2 + $0x60] sm:$0xff]   ;;  %v1921_v26 = vld [vmem:[%s2618_s2 + $0x68] sm:$0xff]   ;;  %v1923_v29 = vld [vmem:[%s2618_s2 + $0x78] sm:$0xff]  }
  0x1b   :  { %1815 = vmatprep.subr.bf16.mxu1 %v1994_v2  ;;  %v1924_v30 = vld [vmem:[%s2618_s2] sm:$0xff]  }
  0x1d   :  { %395 = vperm.xlu1 %1907, %v366_v4  }
  0x1e   :  { %1817 = vmatpush3.bf16.msra.mxu1 %v2114_v18  ;;  %385 = vperm.xlu0 %1906, %v364_v5  }
  0x1f   :  { %1818 = vmatprep.subr.bf16.mxu1 %v1994_v2 }
  0x21   :  { %1909 = vset.pattern.permute.xlu1 %v1998_v6 }
  0x22   :  { %1820 = vmatpush3.bf16.msra.mxu1 %v2124_v21  ;;  %1908 = vset.pattern.permute.xlu0 %v1998_v6 }
  0x23   :  { %1821 = vmatprep.subr.bf16.mxu1 %v1994_v2  ;;  %416 = vperm.xlu1 %1909, %v364_v5  }
  0x24   :  { %412 = vperm.xlu0 %1908, %v363_v1   ;;  %v1929_v1 = vld [vmem:[%s2618_s2 + $0x28] sm:$0xff]  }
  0x26   :  { %1823 = vmatpush3.bf16.msra.mxu1 %v1822_v24 }
  0x27   :  { %1824 = vmatprep.subr.bf16.mxu1 %v1994_v2  ;;  %420 = vperm.xlu1 %1909, %v365_v0  }
  0x28   :  { %424 = vperm.xlu0 %1908, %v366_v4  }
  0x2a   :  { %1826 = vmatpush3.bf16.msra.mxu1 %v1825_v28 }
  0x2b   :  { %1827 = vmatprep.subr.bf16.mxu1 %v1994_v2 }
  0x2e   :  { %1829 = vmatpush3.bf16.msra.mxu1 %v1828_v31 }
  0x2f   :  { %1830 = vmatprep.subr.bf16.mxu1 %v1994_v2 }
  0x98   :  { %v391_v0 = vpop.permute.xlu1 %390 }
  0x9c   :  { %v396_v5 = vpop.permute.xlu1 %395 }
  0xe5   :  { %v1664_v32 = vpop.f32.mrb[0].mxu0 }
  0xe6   :  { %v142_v33 = vpop.f32.mrb[1].mxu0  ;;  %v2156_v37 = vmax.f32 %v1664_v32, 0.0 }
  0xe7   :  { %v2154_v34 = vmax.f32 %v142_v33, 0.0  ;;  %v1665_v35 = vpop.f32.mrb[2].mxu0 }
  0xe8   :  { %v145_v36 = vpop.f32.mrb[3].mxu0  ;;  %v2162_v40 = vmax.f32 %v1665_v35, 0.0  ;;  %v172_v43 = vmul.f32 %v2156_v37, %v2156_v37 }
  0xe9   :  { %v2158_v38 = vmax.f32 %v145_v36, 0.0  ;;  %v170_v39 = vmul.f32 %v2154_v34, %v2154_v34 }
  0xea   :  { %v173_v46 = vmul.f32 %v2162_v40, %v2162_v40 }
  0xeb   :  { %v161_v41 = vadd.f32 %v2158_v38, %v2154_v34  ;;  %v171_v42 = vmul.f32 %v2158_v38, %v2158_v38 }
  0xed   :  { %v162_v44 = vadd.f32 %v161_v41, %v2156_v37  ;;  %v174_v45 = vadd.f32 %v171_v42, %v170_v39  ;;  %v381_v42 = vpop.permute.xlu0 %380 }
  0xef   :  { %v163_v47 = vadd.f32 %v162_v44, %v2162_v40  ;;  %v175_v48 = vadd.f32 %v174_v45, %v172_v43 }
  0xf1   :  { %v164_v49 = vrot.slane %v163_v47, 4  ;;  %v176_v50 = vadd.f32 %v175_v48, %v173_v46 }
  0xf3   :  { %v165_v51 = vadd.f32 %v164_v49, %v163_v47  ;;  %v177_v52 = vrot.slane %v176_v50, 4 }
  0xf5   :  { %v166_v53 = vrot.slane %v165_v51, 2  ;;  %v178_v54 = vadd.f32 %v177_v52, %v176_v50 }
  0xf7   :  { %v167_v55 = vadd.f32 %v166_v53, %v165_v51  ;;  %v179_v56 = vrot.slane %v178_v54, 2 }
  0xf9   :  { %v168_v57 = vrot.slane %v167_v55, 1  ;;  %v180_v58 = vadd.f32 %v179_v56, %v178_v54 }
  0xfb   :  { %v181_v59 = vrot.slane %v180_v58, 1  ;;  %v169_v60 = vadd.f32 %v168_v57, %v167_v55 }
  0xfd   :  { %v182_v61 = vadd.f32 %v181_v59, %v180_v58  ;;  %v1925_v59 = vld [vmem:[%s2618_s2 + $0x8] sm:$0xff]  }
  0xff   :  { %v184_v62 = vsel %vm183_vm2, %v169_v60, %v182_v61  ;;  %v1926_v60 = vld [vmem:[%s2618_s2 + $0x10] sm:$0xff]   ;;  %v1927_v61 = vld [vmem:[%s2618_s2 + $0x18] sm:$0xff]  }
 0x100   :  { %1699 = vmatmul.mubr.f32.vlgmr.msra.gmra.mrb[0].mxu1 %v184_v62  ;;  %v1928_v62 = vld [vmem:[%s2618_s2 + $0x20] sm:$0xff]  }
 0x101   :  { %1832 = vmatpush3.bf16.msra.mxu1 %v2080_v8  ;;  %1798 = vmatprep.mubr.msk.f32.mxu1 %vm1995_vm1, %v1996_v27 }
 0x102   :  { %1833 = vmatprep.subr.bf16.mxu1 %v1994_v2 }
 0x105   :  { %1835 = vmatpush3.bf16.msra.mxu1 %v2094_v12 }
 0x106   :  { %1836 = vmatprep.subr.bf16.mxu1 %v1994_v2 }
 0x109   :  { %1838 = vmatpush3.bf16.msra.mxu1 %v2104_v15  ;;  %v2216_v15 = vld [vmem:[%s2625_s9] sm:$0x3f] }
 0x10a   :  { %1839 = vmatprep.subr.bf16.mxu1 %v1994_v2 }
 0x10d   :  { %1841 = vmatpush3.bf16.msra.mxu1 %v2114_v18 }
 0x10e   :  { %1842 = vmatprep.subr.bf16.mxu1 %v1994_v2 }
 0x111   :  { %1844 = vmatpush3.bf16.msra.mxu1 %v2124_v21  ;;  %v1917_v21 = vld [vmem:[%s2618_s2 + $0x48] sm:$0xff]  }
 0x112   :  { %1845 = vmatprep.subr.bf16.mxu1 %v1994_v2 }
 0x115   :  { %1847 = vmatpush3.bf16.msra.mxu1 %v1822_v24  ;;  %v1919_v24 = vld [vmem:[%s2618_s2 + $0x58] sm:$0xff]  }
 0x116   :  { %1848 = vmatprep.subr.bf16.mxu1 %v1994_v2 }
 0x119   :  { %1850 = vmatpush3.bf16.msra.mxu1 %v1825_v28  ;;  %v1922_v28 = vld [vmem:[%s2618_s2 + $0x70] sm:$0xff]  }
 0x11a   :  { %1851 = vmatprep.subr.bf16.mxu1 %v1994_v2  ;;  %v1916_v2 = vld [vmem:[%s2618_s2 + $0x40] sm:$0xff]  }
 0x11b   :  { %1706 = vmatprep.subr.bf16.mxu0 %v1916_v2 }
 0x11d   :  { %1853 = vmatpush3.bf16.msra.mxu1 %v1828_v31  ;;  %v347_v31 = vlaneseq }
 0x11e   :  { %1801 = vmatprep.subr.mxu1 %v1996_v27 }
 0x11f   :  { %v2246_v32 = vshrl.u32 %v347_v31, 7 }
 0x121   :  { %v2249_v33 = vsub.s32 0, %v2246_v32  ;;  %v2252_v35 = vsub.s32 1, %v2246_v32  ;;  %vm373_vm4 = vcmp.lt.s32.totalorder %v2246_v32, 1  ;;  %vm406_vm5 = vcmp.lt.s32.totalorder %v2246_v32, 7 }
 0x1d3   :  { %v251_v7 = vpop.f32.mrb[0].mxu1 }
 0x1d4   :  { %v255_v8 = vmul.f32 %v251_v7, %v251_v7  ;;  %v1700_v9 = vpop.f32.mrb[1].mxu1 }
 0x1d5   :  { %v1931_v9 = vld [vmem:[%s2618_s2 + $0x38] sm:$0xff]  }
 0x1d6   :  { %v257_v10 = vrot.slane %v255_v8, 7 }
 0x1d8   :  { %v259_v11 = vsub.f32 %v251_v7, %v257_v10 }
 0x1da   :  { %v260_v12 = vmax.f32 %v259_v11, 0.0 }
 0x1dc   :  { %v261_v13 = vadd.f32 1e-05, %v260_v12 }
 0x1de   :  { %1964 = vrsqrt.f32 %v261_v13 }
 0x1e8   :  { %v1965_v14 = vpop.eup %1964 }
 0x1e9   :  { %v264_v16 = vrot.slane %v1965_v14, 1 }
 0x1eb   :  { %v266_v17 = vmul.f32 %v264_v16, %v2216_v15 }
 0x1ed   :  { %v267_v18 = vmul.f32 %v266_v17, %v251_v7 }
 0x1ef   :  { %v269_v19 = vrot.slane %v267_v18, 7 }
 0x1f1   :  { %v271_v20 = vsub.f32 %v2216_v15, %v269_v19  ;;  %v1932_v19 = vld [vmem:[%s2618_s2 + $0x80] sm:$0xff]  }
 0x1f3   :  { %v272_v22 = vsel %vm183_vm2, %v266_v17, %v271_v20  ;;  %v417_v17 = vpop.permute.xlu1 %416 }
 0x1f4   :  { %1704 = vmatmul.mubr.msk.f32.vlgmr.msra.gmra.mrb[4].mxu0 %vm273_vm3, %v272_v22 }
 0x1f5   :  { %1707 = vmatpush3.bf16.msra.mxu0 %v1916_v2  ;;  %v1930_v2 = vld [vmem:[%s2618_s2 + $0x30] sm:$0xff]  }
 0x1f6   :  { %1708 = vmatprep.subr.bf16.mxu0 %v1917_v21 }
 0x1f9   :  { %1709 = vmatpush3.bf16.msra.mxu0 %v1917_v21 }
 0x1fa   :  { %1710 = vmatprep.subr.bf16.mxu0 %v1918_v23 }
 0x1fd   :  { %1711 = vmatpush3.bf16.msra.mxu0 %v1918_v23  ;;  %v1933_v23 = vld [vmem:[%s2618_s2 + $0x88] sm:$0xff]  }
 0x1fe   :  { %1712 = vmatprep.subr.bf16.mxu0 %v1919_v24 }
 0x201   :  { %1713 = vmatpush3.bf16.msra.mxu0 %v1919_v24 }
 0x202   :  { %1714 = vmatprep.subr.bf16.mxu0 %v1920_v25 }
 0x205   :  { %1715 = vmatpush3.bf16.msra.mxu0 %v1920_v25  ;;  %v1934_v25 = vld [vmem:[%s2618_s2 + $0x90] sm:$0xff]  }
 0x206   :  { %1716 = vmatprep.subr.bf16.mxu0 %v1921_v26 }
 0x209   :  { %1717 = vmatpush3.bf16.msra.mxu0 %v1921_v26  ;;  %v1935_v26 = vld [vmem:[%s2618_s2 + $0x98] sm:$0xff]  }
 0x20a   :  { %1718 = vmatprep.subr.bf16.mxu0 %v1922_v28 }
 0x20d   :  { %1719 = vmatpush3.bf16.msra.mxu0 %v1922_v28  ;;  %v1936_v28 = vld [vmem:[%s2618_s2 + $0xa0] sm:$0xff]  }
 0x20e   :  { %1720 = vmatprep.subr.bf16.mxu0 %v1923_v29 }
 0x211   :  { %1721 = vmatpush3.bf16.msra.mxu0 %v1923_v29  ;;  %v1937_v29 = vld [vmem:[%s2618_s2 + $0xa8] sm:$0xff]  }
 0x212   :  { %1726 = vmatprep.subr.bf16.mxu0 %v1924_v30 }
 0x2c7   :  { %v343_v36 = vpop.f32.mrb[4].mxu0 }
 0x2c8   :  { %v350_v39 = vrot.slane %v343_v36, %v2249_v33  ;;  %v1705_v41 = vpop.f32.mrb[5].mxu0  ;;  %v358_v46 = vrot.slane %v343_v36, %v2252_v35  ;;  %v1939_v36 = vld [vmem:[%s2618_s2 + $0xb8] sm:$0xff]  }
 0x2ca   :  { %v351_v43 = vmul.f32 %v350_v39, %v2154_v34  ;;  %v352_v44 = vmul.f32 %v350_v39, %v2158_v38  ;;  %v354_v45 = vmul.f32 %v350_v39, %v2162_v40  ;;  %v353_v47 = vmul.f32 %v350_v39, %v2156_v37  ;;  %v386_v40 = vpop.permute.xlu0 %385  ;;  %v421_v39 = vpop.permute.xlu1 %420 }
 0x2cc   :  { %v2260_v48 = vadd.f32 %v358_v46, %v351_v43  ;;  %v2262_v49 = vadd.f32 %v358_v46, %v352_v44  ;;  %v2264_v50 = vadd.f32 %v358_v46, %v354_v45  ;;  %v2270_v52 = vadd.f32 %v358_v46, %v353_v47 }
 0x2ce   :  { %v368_v51 = vrot.slane %v2262_v49, 7  ;;  %v370_v34 = vrot.slane %v2264_v50, 7  ;;  %v367_v38 = vrot.slane %v2260_v48, 7  ;;  %v431_v57 = vpack.c.bf16 %v2262_v49, %v2260_v48  ;;  %v413_v18 = vpop.permute.xlu0 %412 }
 0x2cf   :  { %v432_v58 = vpack.c.bf16 %v2264_v50, %v2270_v52  ;;  %v369_v4 = vrot.slane %v2270_v52, 7  ;;  %v403_v6 = vrot.slane %v2262_v49, 1  ;;  %v404_v7 = vrot.slane %v2270_v52, 1 }
 0x2d0   :  { %v376_v37 = vsel %vm373_vm4, %v367_v38, %v368_v51  ;;  %v377_v53 = vsel %vm373_vm4, %v370_v34, %v367_v38  ;;  %1722 = vmatprep.mubr.bf16.mxu0 %v431_v57  ;;  %v402_v8 = vrot.slane %v2260_v48, 1  ;;  %v405_v31 = vrot.slane %v2264_v50, 1 }
 0x2d1   :  { %v398_v54 = vmul.f32 %v381_v42, %v377_v53  ;;  %v399_v55 = vmul.f32 %v386_v40, %v376_v37  ;;  %1723 = vmatmul.mubr.bf16.vlgmr.msra.gmra.mrb[8].mxu0 %v432_v58  ;;  %v374_v10 = vsel %vm373_vm4, %v369_v4, %v370_v34  ;;  %v375_v11 = vsel %vm373_vm4, %v368_v51, %v369_v4 }
 0x2d2   :  { %1727 = vmatpush3.bf16.msra.mxu0 %v1924_v30  ;;  %v408_v12 = vsel %vm406_vm5, %v403_v6, %v404_v7  ;;  %v409_v13 = vsel %vm406_vm5, %v402_v8, %v403_v6  ;;  %v400_v14 = vmul.f32 %v391_v0, %v375_v11  ;;  %v401_v16 = vmul.f32 %v396_v5, %v374_v10  ;;  %v1938_v30 = vld [vmem:[%s2618_s2 + $0xb0] sm:$0xff]   ;;  %v425_v42 = vpop.permute.xlu0 %424 }
 0x2d3   :  { %v433_v56 = vpack.c.bf16 %v399_v55, %v398_v54  ;;  %1728 = vmatprep.subr.bf16.mxu0 %v1925_v59  ;;  %v428_v20 = vmul.f32 %v417_v17, %v408_v12  ;;  %v427_v21 = vmul.f32 %v413_v18, %v409_v13  ;;  %v407_v41 = vsel %vm406_vm5, %v404_v7, %v405_v31 }
 0x2d4   :  { %v434_v22 = vpack.c.bf16 %v401_v16, %v400_v14  ;;  %v410_v43 = vsel %vm406_vm5, %v405_v31, %v402_v8  ;;  %v429_v44 = vmul.f32 %v421_v39, %v407_v41  ;;  %v1942_v16 = vld [vmem:[%s2619_s3 + $0x4] ss:$8 sps:$4 sm:$0xff]   ;;  %v1940_v31 = vld [vmem:[%s2619_s3] ss:$8 sps:$4 sm:$0xff]   ;;  %v1943_v41 = vld [vmem:[%s2619_s3 + $0x10] ss:$8 sps:$4 sm:$0xff]  }
 0x2d5   :  { %1742 = vmatprep.mubr.bf16.mxu0 %v433_v56  ;;  %v662_v24 = vpack.c.bf16 %v428_v20, %v427_v21  ;;  %v430_v45 = vmul.f32 %v425_v42, %v410_v43  ;;  %v1948_v42 = vld [vmem:[%s2619_s3 + $0x24] ss:$8 sps:$4 sm:$0xff]   ;;  %v1946_v43 = vld [vmem:[%s2619_s3 + $0x20] ss:$8 sps:$4 sm:$0xff]  }
 0x2d6   :  { %1729 = vmatpush3.bf16.msra.mxu0 %v1925_v59 }
 0x2d7   :  { %1730 = vmatprep.subr.bf16.mxu0 %v1926_v60  ;;  %v663_v46 = vpack.c.bf16 %v430_v45, %v429_v44  ;;  %v1951_v44 = vld [vmem:[%s2619_s3 + $0x34] ss:$8 sps:$4 sm:$0xff]   ;;  %v1949_v45 = vld [vmem:[%s2619_s3 + $0x30] ss:$8 sps:$4 sm:$0xff]  }
 0x2da   :  { %1731 = vmatpush3.bf16.msra.mxu0 %v1926_v60 }
 0x2db   :  { %1732 = vmatprep.subr.bf16.mxu0 %v1927_v61 }
 0x2de   :  { %1733 = vmatpush3.bf16.msra.mxu0 %v1927_v61 }
 0x2df   :  { %1734 = vmatprep.subr.bf16.mxu0 %v1928_v62 }
 0x2e2   :  { %1735 = vmatpush3.bf16.msra.mxu0 %v1928_v62 }
 0x2e3   :  { %1736 = vmatprep.subr.bf16.mxu0 %v1929_v1 }
 0x2e6   :  { %1737 = vmatpush3.bf16.msra.mxu0 %v1929_v1 }
 0x2e7   :  { %1738 = vmatprep.subr.bf16.mxu0 %v1930_v2 }
 0x2ea   :  { %1739 = vmatpush3.bf16.msra.mxu0 %v1930_v2 }
 0x2eb   :  { %1740 = vmatprep.subr.bf16.mxu0 %v1931_v9 }
 0x2ee   :  { %1741 = vmatpush3.bf16.msra.mxu0 %v1931_v9 }
 0x2ef   :  { %1746 = vmatprep.subr.bf16.mxu0 %v1932_v19 }
 0x2f1   :  { %1743 = vmatmul.mubr.bf16.vlgmr.msra.gmra.mrb[8].mxu0 %v434_v22 }
 0x2f2   :  { %1747 = vmatpush3.bf16.msra.mxu0 %v1932_v19  ;;  %1762 = vmatprep.mubr.bf16.mxu0 %v662_v24 }
 0x2f3   :  { %1748 = vmatprep.subr.bf16.mxu0 %v1933_v23 }
 0x2f6   :  { %1749 = vmatpush3.bf16.msra.mxu0 %v1933_v23 }
 0x2f7   :  { %1750 = vmatprep.subr.bf16.mxu0 %v1934_v25 }
 0x2fa   :  { %1751 = vmatpush3.bf16.msra.mxu0 %v1934_v25 }
 0x2fb   :  { %1752 = vmatprep.subr.bf16.mxu0 %v1935_v26 }
 0x2fe   :  { %1753 = vmatpush3.bf16.msra.mxu0 %v1935_v26 }
 0x2ff   :  { %1754 = vmatprep.subr.bf16.mxu0 %v1936_v28 }
 0x302   :  { %1755 = vmatpush3.bf16.msra.mxu0 %v1936_v28 }
 0x303   :  { %1756 = vmatprep.subr.bf16.mxu0 %v1937_v29 }
 0x306   :  { %1757 = vmatpush3.bf16.msra.mxu0 %v1937_v29 }
 0x307   :  { %1758 = vmatprep.subr.bf16.mxu0 %v1938_v30 }
 0x30a   :  { %1759 = vmatpush3.bf16.msra.mxu0 %v1938_v30 }
 0x30b   :  { %1760 = vmatprep.subr.bf16.mxu0 %v1939_v36 }
 0x30e   :  { %1761 = vmatpush3.bf16.msra.mxu0 %v1939_v36  ;;  %v1945_v36 = vld [vmem:[%s2619_s3 + $0x14] ss:$8 sps:$4 sm:$0xff]  }
 0x311   :  { %1763 = vmatmul.mubr.bf16.vlgmr.msra.gmra.mrb[8].mxu0 %v663_v46  ;;  %v1954_v46 = vld [vmem:[%s2619_s3 + $0x44] ss:$8 sps:$4 sm:$0xff]  }
 0x312   :  { %1399 = vmatprep.mubr.f32.mxu0 %v1996_v27 }
 0x3e4   :  { %v1764_v47 = vpop.f32.mrb[8].mxu0 }
 0x3e5   :  { %v763_v51 = vpop.f32.mrb[9].mxu0  ;;  %v2346_v37 = vmax.f32 %v1764_v47, 0.0  ;;  %v1952_v47 = vld [vmem:[%s2619_s3 + $0x40] ss:$8 sps:$4 sm:$0xff]  }
 0x3e6   :  { %v2344_v34 = vmax.f32 %v763_v51, 0.0  ;;  %v1765_v38 = vpop.f32.mrb[10].mxu0  ;;  %v1957_v51 = vld [vmem:[%s2619_s3 + $0x54] ss:$8 sps:$4 sm:$0xff]  }
 0x3e7   :  { %v766_v40 = vpop.f32.mrb[11].mxu0  ;;  %v2352_v54 = vmax.f32 %v1765_v38, 0.0  ;;  %v797_v57 = vmul.f32 %v2346_v37, %v2346_v37  ;;  %v1955_v38 = vld [vmem:[%s2619_s3 + $0x50] ss:$8 sps:$4 sm:$0xff]  }
 0x3e8   :  { %v2348_v53 = vmax.f32 %v766_v40, 0.0  ;;  %v795_v32 = vmul.f32 %v2344_v34, %v2344_v34  ;;  %v1960_v40 = vld [vmem:[%s2619_s3 + $0x64] ss:$8 sps:$4 sm:$0xff]  }
 0x3e9   :  { %v798_v60 = vmul.f32 %v2352_v54, %v2352_v54 }
 0x3ea   :  { %v786_v55 = vadd.f32 %v2348_v53, %v2344_v34  ;;  %v796_v56 = vmul.f32 %v2348_v53, %v2348_v53 }
 0x3ec   :  { %v787_v58 = vadd.f32 %v786_v55, %v2346_v37  ;;  %v799_v59 = vadd.f32 %v796_v56, %v795_v32  ;;  %v1958_v32 = vld [vmem:[%s2619_s3 + $0x60] ss:$8 sps:$4 sm:$0xff]   ;;  %v1961_v55 = vld [vmem:[%s2619_s3 + $0x70] ss:$8 sps:$4 sm:$0xff]   ;;  %v1963_v56 = vld [vmem:[%s2619_s3 + $0x74] ss:$8 sps:$4 sm:$0xff]  }
 0x3ee   :  { %v788_v61 = vadd.f32 %v787_v58, %v2352_v54  ;;  %v800_v62 = vadd.f32 %v799_v59, %v797_v57 }
 0x3f0   :  { %v789_v0 = vrot.slane %v788_v61, 4  ;;  %v801_v1 = vadd.f32 %v800_v62, %v798_v60 }
 0x3f2   :  { %v790_v2 = vadd.f32 %v789_v0, %v788_v61  ;;  %v802_v4 = vrot.slane %v801_v1, 4 }
 0x3f4   :  { %v791_v5 = vrot.slane %v790_v2, 2  ;;  %v803_v6 = vadd.f32 %v802_v4, %v801_v1 }
 0x3f6   :  { %v792_v7 = vadd.f32 %v791_v5, %v790_v2  ;;  %v804_v8 = vrot.slane %v803_v6, 2 }
 0x3f8   :  { %v793_v9 = vrot.slane %v792_v7, 1  ;;  %v805_v10 = vadd.f32 %v804_v8, %v803_v6 }
 0x3fa   :  { %v806_v11 = vrot.slane %v805_v10, 1  ;;  %v794_v12 = vadd.f32 %v793_v9, %v792_v7 }
 0x3fc   :  { %v807_v13 = vadd.f32 %v806_v11, %v805_v10  ;;  %v1166_v11 = vld [vmem:[%s2623_s7 + $0x98] sm:$0xff] }
 0x3fe   :  { %v808_v14 = vsel %vm183_vm2, %v794_v12, %v807_v13  ;;  %v1149_v13 = vld [vmem:[%s2623_s7 + $0x10] sm:$0xff] }
 0x3ff   :  { %1799 = vmatmul.mubr.f32.vlgmr.msra.gmra.mrb[2].mxu1 %v808_v14  ;;  %v1150_v14 = vld [vmem:[%s2623_s7 + $0x18] sm:$0xff] }
 0x400   :  { %1802 = vmatpush3.msra.mxu1 %v2193_v63  ;;  %1803 = vmatprep.mubr.msk.f32.mxu1 %vm1995_vm1, %v1996_v27 }
 0x401   :  { %1094 = vmatprep.subr.bf16.mxu1 %v1942_v16  ;;  %v1860_v16 = vpack.c.bf16 %v1150_v14, %v1149_v13 }
 0x4d2   :  { %v875_v17 = vpop.f32.mrb[2].mxu1 }
 0x4d3   :  { %v879_v18 = vmul.f32 %v875_v17, %v875_v17  ;;  %v1800_v19 = vpop.f32.mrb[3].mxu1 }
 0x4d5   :  { %v881_v20 = vrot.slane %v879_v18, 7  ;;  %v1168_v18 = vld [vmem:[%s2623_s7 + $0xa8] sm:$0xff] }
 0x4d7   :  { %v883_v21 = vsub.f32 %v875_v17, %v881_v20  ;;  %v1151_v20 = vld [vmem:[%s2623_s7 + $0x20] sm:$0xff] }
 0x4d9   :  { %v884_v22 = vmax.f32 %v883_v21, 0.0  ;;  %v1152_v21 = vld [vmem:[%s2623_s7 + $0x28] sm:$0xff] }
 0x4db   :  { %v885_v23 = vadd.f32 1e-05, %v884_v22  ;;  %v1864_v22 = vpack.c.bf16 %v1152_v21, %v1151_v20 }
 0x4dd   :  { %1966 = vrsqrt.f32 %v885_v23  ;;  %v1169_v23 = vld [vmem:[%s2623_s7 + $0xb0] sm:$0xff] }
 0x4e7   :  { %v1967_v24 = vpop.eup %1966 }
 0x4e8   :  { %v888_v25 = vrot.slane %v1967_v24, 7  ;;  %v1170_v24 = vld [vmem:[%s2623_s7 + $0xb8] sm:$0xff] }
 0x4ea   :  { %v890_v63 = vmul.f32 %v888_v25, %v2216_v15  ;;  %v1866_v25 = vpack.c.bf16 %v1170_v24, %v1169_v23 }
 0x4ec   :  { %v892_v26 = vrot.slane %v890_v63, 2  ;;  %v1153_v63 = vld [vmem:[%s2623_s7 + $0x30] sm:$0xff] }
 0x4ee   :  { %v894_v28 = vmul.f32 %v892_v26, %v875_v17  ;;  %v1167_v17 = vld [vmem:[%s2623_s7 + $0xa0] sm:$0xff] }
 0x4ef   :  { %v1862_v19 = vpack.c.bf16 %v1168_v18, %v1167_v17 }
 0x4f0   :  { %v896_v27 = vrot.slane %v894_v28, 5 }
 0x4f2   :  { %v898_v29 = vsub.f32 %v2216_v15, %v896_v27  ;;  %v1171_v27 = vld [vmem:[%s2623_s7 + $0xc0] sm:$0xff] }
 0x4f4   :  { %v900_v30 = vrot.slane %v898_v29, 2  ;;  %v1172_v29 = vld [vmem:[%s2623_s7 + $0xc8] sm:$0xff] }
 0x4f6   :  { %v902_v39 = vsel %vm183_vm2, %v892_v26, %v900_v30  ;;  %v1154_v26 = vld [vmem:[%s2623_s7 + $0x38] sm:$0xff]  ;;  %v1870_v30 = vpack.c.bf16 %v1172_v29, %v1171_v27 }
 0x4f7   :  { %1804 = vmatmul.mubr.msk.f32.vlgmr.msra.gmra.mrb[4].mxu1 %vm273_vm3, %v902_v39  ;;  %v1868_v28 = vpack.c.bf16 %v1154_v26, %v1153_v63 }
 0x4f8   :  { %1095 = vmatpush1.bf16.msra.mxu1 %v1940_v31  ;;  %1126 = vmatprep.mubr.bf16.mxu1 %v1997_v3  ;;  %v1155_v31 = vld [vmem:[%s2623_s7 + $0x40] sm:$0xff] }
 0x4f9   :  { %1096 = vmatprep.subr.bf16.mxu1 %v1945_v36  ;;  %v1156_v36 = vld [vmem:[%s2623_s7 + $0x48] sm:$0xff] }
 0x4fa   :  { %v1872_v39 = vpack.c.bf16 %v1156_v36, %v1155_v31 }
 0x4fc   :  { %1097 = vmatpush1.bf16.msra.mxu1 %v1943_v41  ;;  %v1173_v41 = vld [vmem:[%s2623_s7 + $0xd0] sm:$0xff] }
 0x4fd   :  { %1098 = vmatprep.subr.bf16.mxu1 %v1948_v42  ;;  %v1174_v42 = vld [vmem:[%s2623_s7 + $0xd8] sm:$0xff] }
 0x500   :  { %1099 = vmatpush1.bf16.msra.mxu1 %v1946_v43  ;;  %v1874_v43 = vpack.c.bf16 %v1174_v42, %v1173_v41 }
 0x501   :  { %1100 = vmatprep.subr.bf16.mxu1 %v1951_v44  ;;  %v1157_v44 = vld [vmem:[%s2623_s7 + $0x50] sm:$0xff] }
 0x504   :  { %1101 = vmatpush1.bf16.msra.mxu1 %v1949_v45  ;;  %v1158_v45 = vld [vmem:[%s2623_s7 + $0x58] sm:$0xff] }
 0x505   :  { %1102 = vmatprep.subr.bf16.mxu1 %v1954_v46  ;;  %v1876_v46 = vpack.c.bf16 %v1158_v45, %v1157_v44 }
 0x508   :  { %1103 = vmatpush1.bf16.msra.mxu1 %v1952_v47  ;;  %v1175_v47 = vld [vmem:[%s2623_s7 + $0xe0] sm:$0xff] }
 0x509   :  { %1104 = vmatprep.subr.bf16.mxu1 %v1957_v51  ;;  %v1176_v51 = vld [vmem:[%s2623_s7 + $0xe8] sm:$0xff] }
 0x50c   :  { %1105 = vmatpush1.bf16.msra.mxu1 %v1955_v38  ;;  %v1878_v38 = vpack.c.bf16 %v1176_v51, %v1175_v47 }
 0x50d   :  { %1106 = vmatprep.subr.bf16.mxu1 %v1960_v40  ;;  %v1159_v40 = vld [vmem:[%s2623_s7 + $0x60] sm:$0xff] }
 0x510   :  { %1107 = vmatpush1.bf16.msra.mxu1 %v1958_v32  ;;  %v1160_v32 = vld [vmem:[%s2623_s7 + $0x68] sm:$0xff] }
 0x511   :  { %1108 = vmatprep.subr.bf16.mxu1 %v1963_v56  ;;  %v1177_v56 = vld [vmem:[%s2623_s7 + $0xf0] sm:$0xff] }
 0x514   :  { %1109 = vmatpush1.bf16.msra.mxu1 %v1961_v55  ;;  %v1880_v55 = vpack.c.bf16 %v1160_v32, %v1159_v40 }
 0x5ca   :  { %v972_v57 = vpop.f32.mrb[4].mxu1 }
 0x5cb   :  { %v979_v58 = vrot.slane %v972_v57, %v2249_v33  ;;  %v1805_v59 = vpop.f32.mrb[5].mxu1  ;;  %v987_v62 = vrot.slane %v972_v57, %v2252_v35  ;;  %v1178_v57 = vld [vmem:[%s2623_s7 + $0xf8] sm:$0xff] }
 0x5cc   :  { %v1882_v59 = vpack.c.bf16 %v1178_v57, %v1177_v56 }
 0x5cd   :  { %v980_v60 = vmul.f32 %v979_v58, %v2344_v34  ;;  %v981_v61 = vmul.f32 %v979_v58, %v2348_v53  ;;  %v982_v0 = vmul.f32 %v979_v58, %v2346_v37  ;;  %v983_v1 = vmul.f32 %v979_v58, %v2352_v54  ;;  %v1163_v37 = vld [vmem:[%s2623_s7 + $0x80] sm:$0xff]  ;;  %v1161_v58 = vld [vmem:[%s2623_s7 + $0x70] sm:$0xff] }
 0x5ce   :  { %v1147_v54 = vld [vmem:[%s2623_s7] sm:$0xff] }
 0x5cf   :  { %v988_v2 = vadd.f32 %v987_v62, %v980_v60  ;;  %v989_v4 = vadd.f32 %v987_v62, %v981_v61  ;;  %v990_v8 = vadd.f32 %v987_v62, %v982_v0  ;;  %v991_v9 = vadd.f32 %v987_v62, %v983_v1  ;;  %v1162_v60 = vld [vmem:[%s2623_s7 + $0x78] sm:$0xff] }
 0x5d0   :  { %v1884_v61 = vpack.c.bf16 %v1162_v60, %v1161_v58 }
 0x5d1   :  { %v992_v5 = vadd.f32 %v988_v2, %v2260_v48  ;;  %v993_v6 = vadd.f32 %v989_v4, %v2262_v49  ;;  %v994_v34 = vadd.f32 %v990_v8, %v2270_v52  ;;  %v995_v53 = vadd.f32 %v991_v9, %v2264_v50  ;;  %v1164_v48 = vld [vmem:[%s2623_s7 + $0x88] sm:$0xff]  ;;  %v1165_v52 = vld [vmem:[%s2623_s7 + $0x90] sm:$0xff] }
 0x5d2   :  { %v1854_v49 = vpack.c.bf16 %v1164_v48, %v1163_v37  ;;  %v1858_v12 = vpack.c.bf16 %v1166_v11, %v1165_v52 }
 0x5d3   :  { %v996_v7 = vpack.c.bf16 %v993_v6, %v992_v5  ;;  %v997_v10 = vpack.c.bf16 %v995_v53, %v994_v34 }
 0x5d4   :  { %1855 = vmatprep.subr.bf16.mxu1 %v1854_v49 }
 0x5d5   :  { %1127 = vmatmul.mubr.bf16.vlgmr.msra.gmra.mrb[8].mxu1 %v996_v7 }
 0x5d6   :  { %1136 = vmatprep.mubr.bf16.mxu1 %v1997_v3  ;;  %v1148_v3 = vld [vmem:[%s2623_s7 + $0x8] sm:$0xff] }
 0x5d7   :  { %v1856_v50 = vpack.c.bf16 %v1148_v3, %v1147_v54 }
 0x5d9   :  { %1857 = vmatpush3.bf16.msra.mxu1 %v1856_v50 }
 0x5da   :  { %1859 = vmatprep.subr.bf16.mxu1 %v1858_v12 }
 0x5dd   :  { %1137 = vmatmul.mubr.bf16.gmra.mrb[12].mxu1 %v997_v10 }
 0x5de   :  { %1861 = vmatpush3.bf16.msra.mxu1 %v1860_v16 }
 0x5df   :  { %1863 = vmatprep.subr.bf16.mxu1 %v1862_v19 }
 0x5e2   :  { %1865 = vmatpush3.bf16.msra.mxu1 %v1864_v22 }
 0x5e3   :  { %1867 = vmatprep.subr.bf16.mxu1 %v1866_v25 }
 0x5e6   :  { %1869 = vmatpush3.bf16.msra.mxu1 %v1868_v28 }
 0x5e7   :  { %1871 = vmatprep.subr.bf16.mxu1 %v1870_v30 }
 0x5ea   :  { %1873 = vmatpush3.bf16.msra.mxu1 %v1872_v39 }
 0x5eb   :  { %1875 = vmatprep.subr.bf16.mxu1 %v1874_v43 }
 0x5ee   :  { %1877 = vmatpush3.bf16.msra.mxu1 %v1876_v46 }
 0x5ef   :  { %1879 = vmatprep.subr.bf16.mxu1 %v1878_v38 }
 0x5f2   :  { %1881 = vmatpush3.bf16.msra.mxu1 %v1880_v55 }
 0x5f3   :  { %1883 = vmatprep.subr.bf16.mxu1 %v1882_v59 }
 0x5f6   :  { %1885 = vmatpush3.bf16.msra.mxu1 %v1884_v61 }
 0x6a8   :  { %v1128_v62 = vpop.f32.mrb[8].mxu1 }
 0x6a9   :  { %v1130_v0 = vpop.f32.mrb[9].mxu1  ;;  %v2532_v6 = vmax.f32 %v1128_v62, 0.0 }
 0x6aa   :  { %v1132_v1 = vpop.f32.mrb[10].mxu1  ;;  %v2534_v7 = vmax.f32 %v1130_v0, 0.0  ;;  %v1180_v0 = vld [vmem:[%s2624_s8 + $0x8] sm:$0xff] }
 0x6ab   :  { %v2528_v2 = vmax.f32 %v1132_v1, 0.0  ;;  %v1134_v4 = vpop.f32.mrb[11].mxu1  ;;  %v1209_v53 = vmul.f32 %v2532_v6, %v2532_v6  ;;  %v1182_v1 = vld [vmem:[%s2624_s8 + $0x18] sm:$0xff] }
 0x6ac   :  { %v2530_v5 = vmax.f32 %v1134_v4, 0.0  ;;  %v1210_v49 = vmul.f32 %v2534_v7, %v2534_v7  ;;  %v1886_v4 = vpack.c.bf16 %v1182_v1, %v1180_v0 }
 0x6ad   :  { %v1211_v8 = vmul.f32 %v2528_v2, %v2528_v2  ;;  %v1191_v10 = vadd.f32 %v2528_v2, %v2532_v6 }
 0x6ae   :  { %v1212_v9 = vmul.f32 %v2530_v5, %v2530_v5  ;;  %v1200_v54 = vadd.f32 %v2530_v5, %v2534_v7  ;;  %1887 = vmatprep.subr.bf16.mxu0 %v1886_v4 }
 0x6af   :  { %v1217_v52 = vadd.f32 %v1211_v8, %v1209_v53  ;;  %v1179_v8 = vld [vmem:[%s2624_s8] sm:$0xff] }
 0x6b0   :  { %v1138_v34 = vpop.f32.mrb[12].mxu1  ;;  %v1226_v16 = vadd.f32 %v1212_v9, %v1210_v49  ;;  %v1181_v9 = vld [vmem:[%s2624_s8 + $0x10] sm:$0xff]  ;;  %s1999_s8 = smov [#allocation2]  }
 0x6b1   :  { %v2544_v37 = vmax.f32 %v1138_v34, 0.0  ;;  %v1140_v48 = vpop.f32.mrb[13].mxu1  ;;  %v1888_v34 = vpack.c.bf16 %v1181_v9, %v1179_v8  ;;  %s1451_s5 = sshll.u32 %s1999_s8, 4  ;;  %s2597_s5 = int_to_ptr.vmem [resolvable:$true] %s1451_s5 }
 0x6b2   :  { %v2550_v3 = vmax.f32 %v1140_v48, 0.0  ;;  %v1142_v50 = vpop.f32.mrb[14].mxu1  ;;  %s1970_s13 = scalar_lea.vmem %s2597_s5, 1024  ;;  %p1975_p1 = scmp.lt.s32.totalorder %s2597_s5, %s2597_s5 }
 0x6b3   :  { %v1192_v11 = vadd.f32 %v1191_v10, %v2544_v37  ;;  %v1213_v12 = vmul.f32 %v2544_v37, %v2544_v37  ;;  %v2555_v13 = vmax.f32 %v1142_v50, 0.0  ;;  %v1144_v14 = vpop.f32.mrb[15].mxu1  ;;  %1889 = vmatpush1.bf16.msra.mxu0 %v1888_v34  ;;  %p1971_p0 = scmp.ne.s32.totalorder %s2597_s5, %s1970_s13  ;;  %p1976_p2 = scmp.lt.s32.totalorder %s1970_s13, %s1970_s13 }
 0x6b4   :  { %v1201_v17 = vadd.f32 %v1200_v54, %v2550_v3  ;;  %v1214_v18 = vmul.f32 %v2550_v3, %v2550_v3  ;;  %v2560_v19 = vmax.f32 %v1144_v14, 0.0 }
 0x6b5   :  { %v1218_v20 = vadd.f32 %v1217_v52, %v1213_v12  ;;  %v1193_v21 = vadd.f32 %v1192_v11, %v2555_v13  ;;  %v1215_v22 = vmul.f32 %v2555_v13, %v2555_v13  ;;  %p1977_p3 = por %p1976_p2, %p1975_p1 }
 0x6b6   :  { %v1227_v23 = vadd.f32 %v1226_v16, %v1214_v18  ;;  %v1202_v24 = vadd.f32 %v1201_v17, %v2560_v19  ;;  %v1216_v25 = vmul.f32 %v2560_v19, %v2560_v19 }
 0x6b7   :  { %v1194_v63 = vrot.slane %v1193_v21, 4  ;;  %v1219_v26 = vadd.f32 %v1218_v20, %v1215_v22  ;;  %p1978_p4 = pnand %p1977_p3, %p1971_p0 }
 0x6b8   :  { %v1203_v28 = vrot.slane %v1202_v24, 4  ;;  %v1228_v27 = vadd.f32 %v1227_v23, %v1216_v25 }
 0x6b9   :  { %v1195_v29 = vadd.f32 %v1194_v63, %v1193_v21  ;;  %v1220_v30 = vrot.slane %v1219_v26, 4 }
 0x6ba   :  { %v1204_v31 = vadd.f32 %v1203_v28, %v1202_v24  ;;  %v1229_v36 = vrot.slane %v1228_v27, 4 }
 0x6bb   :  { %v1196_v39 = vrot.slane %v1195_v29, 2  ;;  %v1221_v41 = vadd.f32 %v1220_v30, %v1219_v26 }
 0x6bc   :  { %v1205_v42 = vrot.slane %v1204_v31, 2  ;;  %v1230_v43 = vadd.f32 %v1229_v36, %v1228_v27 }
 0x6bd   :  { %v1197_v44 = vadd.f32 %v1196_v39, %v1195_v29  ;;  %v1222_v45 = vrot.slane %v1221_v41, 2 }
 0x6be   :  { %v1206_v46 = vadd.f32 %v1205_v42, %v1204_v31  ;;  %v1231_v47 = vrot.slane %v1230_v43, 2 }
 0x6bf   :  { %v1223_v51 = vadd.f32 %v1222_v45, %v1221_v41  ;;  %v1198_v32 = vrot.slane %v1197_v44, 1 }
 0x6c0   :  { %v1207_v38 = vrot.slane %v1206_v46, 1  ;;  %v1232_v40 = vadd.f32 %v1231_v47, %v1230_v43 }
 0x6c1   :  { %v1224_v55 = vrot.slane %v1223_v51, 1  ;;  %v1199_v60 = vadd.f32 %v1198_v32, %v1197_v44 }
 0x6c2   :  { %v1233_v56 = vrot.slane %v1232_v40, 1  ;;  %v1208_v58 = vadd.f32 %v1207_v38, %v1206_v46 }
 0x6c3   :  { %v1225_v57 = vadd.f32 %v1224_v55, %v1223_v51 }
 0x6c4   :  { %v1234_v59 = vadd.f32 %v1233_v56, %v1232_v40 }
 0x6c5   :  { %v1235_v62 = vsel %vm183_vm2, %v1199_v60, %v1225_v57 }
 0x6c6   :  { %v1236_v61 = vsel %vm183_vm2, %v1208_v58, %v1234_v59 }
 0x6c7   :  { %1301 = vmatprep.mubr.f32.mxu1 %v1236_v61 }
 0x6c8   :  { %1302 = vmatmul.mubr.f32.vlgmr.msra.gmra.mrb[6].mxu1 %v1235_v62 }
 0x79b   :  { %v1651_v53 = vpop.f32.mrb[6].mxu1 }
 0x79c   :  { %v1652_v10 = vpop.f32.mrb[7].mxu1 }
 0x79d   :  { %v1653_v48 = vadd.f32 %v1652_v10, %v1651_v53 }
 0x79f   :  { %v1307_v49 = vmul.f32 %v1653_v48, %v1653_v48 }
 0x7a1   :  { %v1309_v54 = vrot.slane %v1307_v49, 7 }
 0x7a3   :  { %v1311_v50 = vsub.f32 %v1653_v48, %v1309_v54 }
 0x7a5   :  { %v1312_v52 = vmax.f32 %v1311_v50, 0.0 }
 0x7a7   :  { %v1313_v11 = vadd.f32 1e-05, %v1312_v52 }
 0x7a9   :  { %1968 = vrsqrt.f32 %v1313_v11 }
 0x7b3   :  { %v1969_v12 = vpop.eup %1968 }
 0x7b4   :  { %v1316_v14 = vrot.slane %v1969_v12, 5 }
 0x7b6   :  { %v1318_v16 = vmul.f32 %v1316_v14, %v2216_v15 }
 0x7b8   :  { %v1320_v17 = vrot.slane %v1318_v16, 4 }
 0x7ba   :  { %v1322_v18 = vmul.f32 %v1653_v48, %v1320_v17 }
 0x7bc   :  { %v1324_v20 = vrot.slane %v1322_v18, 3 }
 0x7be   :  { %v1326_v21 = vsub.f32 %v2216_v15, %v1324_v20 }
 0x7c0   :  { %v1328_v22 = vrot.slane %v1326_v21, 4 }
 0x7c2   :  { %v1330_v23 = vsel %vm183_vm2, %v1320_v17, %v1328_v22 }
 0x7c3   :  { %1544 = vmatmul.mubr.msk.f32.vlgmr.msra.gmra.mrb[6].mxu0 %vm1331_vm6, %v1330_v23 }
 0x896   :  { %v1401_v24 = vpop.f32.mrb[6].mxu0 }
 0x897   :  { %v1409_v25 = vrot.slane %v1401_v24, %v2249_v33  ;;  %v1403_v63 = vpop.f32.mrb[7].mxu0  ;;  %v1425_v26 = vrot.slane %v1401_v24, %v2252_v35 }
 0x898   :  { %v1413_v28 = vrot.slane %v1403_v63, %v2249_v33  ;;  %v1429_v27 = vrot.slane %v1403_v63, %v2252_v35 }
 0x899   :  { %v1414_v29 = vmul.f32 %v1409_v25, %v2532_v6  ;;  %v1416_v15 = vmul.f32 %v1409_v25, %v2528_v2  ;;  %v1418_v30 = vmul.f32 %v1409_v25, %v2544_v37  ;;  %v1420_v31 = vmul.f32 %v1409_v25, %v2555_v13 }
 0x89a   :  { %v1415_v36 = vmul.f32 %v1413_v28, %v2534_v7  ;;  %v1417_v39 = vmul.f32 %v1413_v28, %v2530_v5  ;;  %v1419_v41 = vmul.f32 %v1413_v28, %v2550_v3  ;;  %v1421_v33 = vmul.f32 %v1413_v28, %v2560_v19 }
 0x89b   :  { %v1430_v42 = vadd.f32 %v1425_v26, %v1414_v29  ;;  %v1432_v35 = vadd.f32 %v1425_v26, %v1416_v15  ;;  %v1434_v43 = vadd.f32 %v1425_v26, %v1418_v30  ;;  %v1436_v44 = vadd.f32 %v1425_v26, %v1420_v31 }
 0x89c   :  { %v1431_v2 = vadd.f32 %v1429_v27, %v1415_v36  ;;  %v1433_v6 = vadd.f32 %v1429_v27, %v1417_v39  ;;  %v1435_v37 = vadd.f32 %v1429_v27, %v1419_v41  ;;  %v1437_v13 = vadd.f32 %v1429_v27, %v1421_v33 }
 0x89d   :  { %1438 = vst [vmem:[#allocation2] sm:$0xff] %v1430_v42  ;;  %1440 = vst [vmem:[#allocation2 + $0x10] sm:$0xff] %v1432_v35 }
 0x89e   :  { %1442 = vst [vmem:[#allocation2 + $0x20] sm:$0xff] %v1434_v43  ;;  %1444 = vst [vmem:[#allocation2 + $0x30] sm:$0xff] %v1436_v44 }
 0x89f   :  { %1439 = vst [vmem:[#allocation2 + $0x8] sm:$0xff] %v1431_v2  ;;  %1441 = vst [vmem:[#allocation2 + $0x18] sm:$0xff] %v1433_v6 }
 0x8a0   :  { %1443 = vst [vmem:[#allocation2 + $0x28] sm:$0xff] %v1435_v37  ;;  %1445 = vst [vmem:[#allocation2 + $0x38] sm:$0xff] %v1437_v13 }
 0x8a1   :  { %1981 = shalt.err (!%p1978_p4)
}
 0x8a2   :  { %s1982_s16 = scalar_lea.hbm %s2626_s10, 1024 }
 0x8a3   :  { %p1983_p5 = scmp.ne.s32.totalorder %s2626_s10, %s1982_s16  ;;  %p1986_p6 = scmp.lt.u32.totalorder %s1982_s16, %s2626_s10 }
 0x8a5   :  { %p1988_p7 = pnand %p1986_p6, %p1983_p5 }
 0x8a7   :  { %1991 = shalt.err (!%p1988_p7)
}
 0x8a8   :  { %s2000_s6 = smov 256   ;;  %s2001_s20 = smov 16  }
 0x8a9   :  { %1457 = dma.vmem_to_hbm [thread:$0]  %s2597_s5, 1024, %s2626_s10, [#allocation3], %s2000_s6, %s2000_s6, %s2001_s20  }
 0x8aa   :  { %1992 = dma.done.wait [#allocation3], 1024  }
 0x8ab   :  { %1993 = vsyncadd [#allocation3], 4294966272 }
 0x8ac   :  { %1461 = vsyncpa [#allocation3], 1 }

</bundles_post_ra>
